<compile_context>
chip_gen: v6e
topology: v6e:2x2x1
jax: 0.10.0
libtpu: 0.0.40
codegen_flags: <defaults>
</compile_context>

<pallas_src>
import jax
import jax.numpy as jnp
from jax.experimental import pallas as pl
from jax.experimental.pallas import tpu as pltpu


def _round_up(x, m):
    return (x + m - 1) // m * m


def _cdiv(a, b):
    return -(-a // b)


def _qvalue_kernel(xa_ref, w1_ref, w2_ref, w3_ref, bias_ref, b3_ref, out_ref):
    # Transposed formulation: activations are (features, batch); batch is on
    # the lane axis so every load/store on the I/O path is lane-dense.
    biases = bias_ref[...]                       # (H_pad, 2) f32, resident
    b1 = biases[:, 0:1]                          # (H_pad, 1)
    b2 = biases[:, 1:2]

    # fc1: (H_pad, K_pad) @ (K_pad, Tb) -> (H_pad, Tb); bf16 MXU, f32 acc.
    h1 = jnp.dot(w1_ref[...], xa_ref[...], preferred_element_type=jnp.float32)
    h1 = jnp.maximum(h1 + b1, 0.0)               # f32 bias + ReLU (v5e-safe)

    # fc2: (H_pad, H_pad) @ (H_pad, Tb) -> (H_pad, Tb).
    h2 = jnp.dot(w2_ref[...], h1.astype(jnp.bfloat16),
                 preferred_element_type=jnp.float32)
    h2 = jnp.maximum(h2 + b2, 0.0)

    # fc_out (out_features == 1): (8, H_pad) @ (H_pad, Tb) -> (8, Tb) on the
    # MXU (rows 1..7 of W3 are zero); row 0 is q.  Lane-dense (1, Tb) store.
    q8 = jnp.dot(w3_ref[...], h2.astype(jnp.bfloat16),
                 preferred_element_type=jnp.float32)
    out_ref[...] = q8[0:1, :] + b3_ref[0]


def _choose_tile_b(B, block_b):
    """Batch tile (multiple of 128 lanes).

    Tiny batches -> single tile.  Larger batches -> >=2 grid steps (so the
    parallel batch axis shards across v7x's two TensorCores), with tiles
    capped near block_b to amortize per-step overhead.
    """
    b128 = _round_up(B, 128)
    if b128 <= 256:
        return b128
    n = max(2, _cdiv(b128, _round_up(block_b, 128)))
    if n % 2:
        n += 1  # even step count -> both v7x TensorCores get equal work
    return _round_up(_cdiv(B, n), 128)


def _vmem_limit_bytes(k_pad, h_pad, tile_b):
    """Scoped-VMEM request from actual buffer math (2x margin, 8 MiB floor)."""
    weights = 2 * ((h_pad * k_pad + h_pad * h_pad + 8 * h_pad) * 2  # bf16
                   + h_pad * 128 * 4)                               # bias blk
    act_io = 2 * (k_pad * tile_b * 2 + 8 * tile_b * 4)              # dbl-buf
    inter = 3 * h_pad * tile_b * 4                                  # h1/h2/q8
    need = weights + act_io + inter
    return int(min(max(2 * need, 8 << 20), 64 << 20))


def qvalue_forward(x, a, params, *, block_b=4096):
    """x: (B, state_dim) f32, a: (B, action_dim) f32 -> (B, 1) f32."""
    w1, w2, w3, biases, b3 = params
    B = x.shape[0]
    h_pad, k_pad = w1.shape

    # Fold concat + feature padding + transpose in the wrapper:
    # [state ; action ; zeros]^T  ->  (K_pad, B) bf16, batch on lanes.
    pad_k = k_pad - (x.shape[1] + a.shape[1])
    xa_t = jnp.concatenate(
        [x.T, a.T, jnp.zeros((pad_k, B), x.dtype)], axis=0
    ).astype(jnp.bfloat16)

    tile_b = _choose_tile_b(B, block_b)
    b_pad = _round_up(B, tile_b)
    if b_pad != B:
        xa_t = jnp.pad(xa_t, ((0, 0), (0, b_pad - B)))

    grid = (b_pad // tile_b,)
    vmem = pltpu.MemorySpace.VMEM

    def resident(shape):
        # Constant index_map -> block never changes -> stays VMEM-resident
        # across grid steps (weights/biases DMA'd once).
        return pl.BlockSpec(shape, lambda i: (0, 0), memory_space=vmem)

    out = pl.pallas_call(
        _qvalue_kernel,
        out_shape=jax.ShapeDtypeStruct((1, b_pad), jnp.float32),
        grid=grid,
        in_specs=[
            pl.BlockSpec((k_pad, tile_b), lambda i: (0, i),
                         memory_space=vmem),                 # xa^T tile (bf16)
            resident((h_pad, k_pad)),                        # W1 (bf16)
            resident((h_pad, h_pad)),                        # W2 (bf16)
            resident((8, h_pad)),                            # W3 rows (bf16)
            resident((h_pad, 2)),                            # [b1 | b2] (f32)
            pl.BlockSpec(memory_space=pltpu.MemorySpace.SMEM),  # bout scalar
        ],
        out_specs=pl.BlockSpec((1, tile_b), lambda i: (0, i),
                               memory_space=vmem),
        compiler_params=pltpu.CompilerParams(
            dimension_semantics=("parallel",),
            vmem_limit_bytes=_vmem_limit_bytes(k_pad, h_pad, tile_b)),
    )(xa_t, w1, w2, w3, biases, b3)

    return out[0, :B].reshape(B, 1)


def init_params(key, state_dim, hidden_dim, action_dim):
    """PyTorch nn.Linear-style init, zero-padded for the kernel layout.

    Weights keep the torch (out, in) layout (the kernel computes W @ x^T).
    K = S+A pads to a multiple of 32, hidden to a multiple of 128 (full lane
    width).  Padded entries are exactly zero, so padded rows/columns stay 0
    through ReLU and contribute nothing downstream.  W1/W2/W3 are stored bf16
    (MXU operands); biases stay f32.
    """
    k_in = state_dim + action_dim
    k_pad = _round_up(k_in, 32)
    h_pad = _round_up(hidden_dim, 128)

    ks = jax.random.split(key, 6)

    def u(k, shape, fan_in):
        bound = 1.0 / jnp.sqrt(jnp.float32(fan_in))
        return jax.random.uniform(k, shape, jnp.float32, -bound, bound)

    w1 = u(ks[0], (hidden_dim, k_in), k_in)            # fc1.weight
    b1 = u(ks[1], (hidden_dim,), k_in)
    w2 = u(ks[2], (hidden_dim, hidden_dim), hidden_dim)
    b2 = u(ks[3], (hidden_dim,), hidden_dim)
    w3 = u(ks[4], (1, hidden_dim), hidden_dim)         # fc_out.weight
    b3 = u(ks[5], (1,), hidden_dim)                    # fc_out.bias

    W1 = jnp.zeros((h_pad, k_pad), jnp.float32).at[:hidden_dim, :k_in].set(w1)
    W2 = jnp.zeros((h_pad, h_pad), jnp.float32).at[:hidden_dim,
                                                   :hidden_dim].set(w2)
    W3 = jnp.zeros((8, h_pad), jnp.float32).at[:1, :hidden_dim].set(w3)
    BIAS = (jnp.zeros((h_pad, 2), jnp.float32)
            .at[:hidden_dim, 0].set(b1)
            .at[:hidden_dim, 1].set(b2))

    return (W1.astype(jnp.bfloat16), W2.astype(jnp.bfloat16),
            W3.astype(jnp.bfloat16), BIAS, b3)


def reference_forward(x, a, params):
    """Pure-JAX reference matching the kernel's mixed precision."""
    w1, w2, w3, biases, b3 = params
    k_pad = w1.shape[1]
    pad_k = k_pad - (x.shape[1] + a.shape[1])
    xa = jnp.concatenate(
        [x, a, jnp.zeros((x.shape[0], pad_k), x.dtype)], axis=1
    ).astype(jnp.bfloat16)
    b1 = biases[:, 0]
    b2 = biases[:, 1]
    h1 = jnp.maximum(
        jnp.dot(xa, w1.T, preferred_element_type=jnp.float32) + b1, 0.0)
    h2 = jnp.maximum(
        jnp.dot(h1.astype(jnp.bfloat16), w2.T,
                preferred_element_type=jnp.float32) + b2, 0.0)
    q8 = jnp.dot(h2.astype(jnp.bfloat16), w3.T,
                 preferred_element_type=jnp.float32)
    return q8[:, 0:1] + b3[0]


if __name__ == "__main__":
    state_dim, action_dim, hidden_dim = 17, 6, 32   # HalfCheetah-ish dims

    key = jax.random.PRNGKey(0)
    kx, ka, kp, kx2, ka2 = jax.random.split(key, 5)
    params = init_params(kp, state_dim, hidden_dim, action_dim)

    # Small batch: single grid step, batch lane-padded 4 -> 128.
    batch = 4
    x = jax.random.normal(kx, (batch, state_dim), jnp.float32)
    a = jax.random.normal(ka, (batch, action_dim), jnp.float32)
    q = jax.block_until_ready(qvalue_forward(x, a, params))
    q_ref = reference_forward(x, a, params)
    assert q.shape == (batch, 1)
    assert jnp.allclose(q, q_ref, atol=1e-3, rtol=1e-3)

    # Larger batch exercising the batch grid (multiple 128-lane tiles, weights
    # VMEM-resident across grid steps, pad columns sliced off).
    batch2 = 300
    x2 = jax.random.normal(kx2, (batch2, state_dim), jnp.float32)
    a2 = jax.random.normal(ka2, (batch2, action_dim), jnp.float32)
    q2 = jax.block_until_ready(qvalue_forward(x2, a2, params, block_b=128))
    q2_ref = reference_forward(x2, a2, params)
    assert q2.shape == (batch2, 1)
    assert jnp.allclose(q2, q2_ref, atol=1e-3, rtol=1e-3)

    print("KERNEL_OK")
</pallas_src>

<mosaic_0001>
module attributes {stable_mosaic.version = 11 : i64} {
  func.func @_qvalue_kernel(%arg0: i32, %arg1: memref<32x128xbf16, #tpu.memory_space<vmem>>, %arg2: memref<128x32xbf16, #tpu.memory_space<vmem>>, %arg3: memref<128x128xbf16, #tpu.memory_space<vmem>>, %arg4: memref<8x128xbf16, #tpu.memory_space<vmem>>, %arg5: memref<128x2xf32, #tpu.memory_space<vmem>>, %arg6: memref<1xf32, #tpu.memory_space<smem>>, %arg7: memref<1x128xf32, #tpu.memory_space<vmem>>) attributes {dimension_semantics = [#tpu.dimension_semantics<parallel>], iteration_bounds = array<i64: 1>, scalar_prefetch = 0 : i64, scratch_operands = 0 : i64, tpu.core_type = #tpu.core_type<tc>, window_params = [{transform_indices = @transform_0, window_bounds = array<i64: 32, 128>}, {pipeline_mode = #tpu.pipeline_mode<synchronous>, transform_indices = @transform_1, window_bounds = array<i64: 128, 32>}, {pipeline_mode = #tpu.pipeline_mode<synchronous>, transform_indices = @transform_2, window_bounds = array<i64: 128, 128>}, {pipeline_mode = #tpu.pipeline_mode<synchronous>, transform_indices = @transform_3, window_bounds = array<i64: 8, 128>}, {pipeline_mode = #tpu.pipeline_mode<synchronous>, transform_indices = @transform_4, window_bounds = array<i64: 128, 2>}, {transform_indices = @transform_5, window_bounds = array<i64: 1>}, {transform_indices = @transform_6, window_bounds = array<i64: 1, 128>}]} {
    %c0 = arith.constant 0 : index
    %c0_0 = arith.constant 0 : index
    %0 = vector.load %arg5[%c0, %c0_0] : memref<128x2xf32, #tpu.memory_space<vmem>>, vector<128x2xf32>
    %1 = vector.extract_strided_slice %0 {offsets = [0, 0], sizes = [128, 1], strides = [1, 1]} : vector<128x2xf32> to vector<128x1xf32>
    %2 = vector.extract_strided_slice %0 {offsets = [0, 1], sizes = [128, 1], strides = [1, 1]} : vector<128x2xf32> to vector<128x1xf32>
    %c0_1 = arith.constant 0 : index
    %c0_2 = arith.constant 0 : index
    %3 = vector.load %arg2[%c0_1, %c0_2] : memref<128x32xbf16, #tpu.memory_space<vmem>>, vector<128x32xbf16>
    %c0_3 = arith.constant 0 : index
    %c0_4 = arith.constant 0 : index
    %4 = vector.load %arg1[%c0_3, %c0_4] : memref<32x128xbf16, #tpu.memory_space<vmem>>, vector<32x128xbf16>
    %cst = arith.constant dense<0.000000e+00> : vector<128x128xf32>
    %5 = tpu.matmul %3, %4, %cst {dimension_numbers = #tpu.dot_dimension_numbers<[1], [0], [0], [1], [0, 0, 1, 1], [], []>} : vector<128x32xbf16>, vector<32x128xbf16>, vector<128x128xf32> -> vector<128x128xf32>
    %6 = vector.broadcast %1 : vector<128x1xf32> to vector<128x128xf32>
    %7 = arith.addf %5, %6 : vector<128x128xf32>
    %cst_5 = arith.constant 0.000000e+00 : f32
    %8 = vector.broadcast %cst_5 : f32 to vector<128x128xf32>
    %9 = arith.maximumf %7, %8 : vector<128x128xf32>
    %c0_6 = arith.constant 0 : index
    %c0_7 = arith.constant 0 : index
    %10 = vector.load %arg3[%c0_6, %c0_7] : memref<128x128xbf16, #tpu.memory_space<vmem>>, vector<128x128xbf16>
    %11 = arith.truncf %9 : vector<128x128xf32> to vector<128x128xbf16>
    %cst_8 = arith.constant dense<0.000000e+00> : vector<128x128xf32>
    %12 = tpu.matmul %10, %11, %cst_8 {dimension_numbers = #tpu.dot_dimension_numbers<[1], [0], [0], [1], [0, 0, 1, 1], [], []>} : vector<128x128xbf16>, vector<128x128xbf16>, vector<128x128xf32> -> vector<128x128xf32>
    %13 = vector.broadcast %2 : vector<128x1xf32> to vector<128x128xf32>
    %14 = arith.addf %12, %13 : vector<128x128xf32>
    %cst_9 = arith.constant 0.000000e+00 : f32
    %15 = vector.broadcast %cst_9 : f32 to vector<128x128xf32>
    %16 = arith.maximumf %14, %15 : vector<128x128xf32>
    %c0_10 = arith.constant 0 : index
    %c0_11 = arith.constant 0 : index
    %17 = vector.load %arg4[%c0_10, %c0_11] : memref<8x128xbf16, #tpu.memory_space<vmem>>, vector<8x128xbf16>
    %18 = arith.truncf %16 : vector<128x128xf32> to vector<128x128xbf16>
    %cst_12 = arith.constant dense<0.000000e+00> : vector<8x128xf32>
    %19 = tpu.matmul %17, %18, %cst_12 {dimension_numbers = #tpu.dot_dimension_numbers<[1], [0], [0], [1], [0, 0, 1, 1], [], []>} : vector<8x128xbf16>, vector<128x128xbf16>, vector<8x128xf32> -> vector<8x128xf32>
    %20 = vector.extract_strided_slice %19 {offsets = [0, 0], sizes = [1, 128], strides = [1, 1]} : vector<8x128xf32> to vector<1x128xf32>
    %c0_13 = arith.constant 0 : index
    %21 = memref.load %arg6[%c0_13] : memref<1xf32, #tpu.memory_space<smem>>
    %22 = vector.broadcast %21 : f32 to vector<1x128xf32>
    %23 = arith.addf %20, %22 : vector<1x128xf32>
    %c0_14 = arith.constant 0 : index
    %c0_15 = arith.constant 0 : index
    %24 = vector.load %arg7[%c0_14, %c0_15] : memref<1x128xf32, #tpu.memory_space<vmem>>, vector<1x128xf32>
    tpu.vector_store %arg7[%c0_14, %c0_15], %23 {strides = array<i32>} : memref<1x128xf32, #tpu.memory_space<vmem>>, vector<1x128xf32>,
    return
  }
  func.func @transform_0(%arg0: i32) -> (i32, i32) {
    %c0_i32 = arith.constant 0 : i32
    %c0_i32_0 = arith.constant 0 : i32
    return %c0_i32, %arg0 : i32, i32
  }
  func.func @transform_1(%arg0: i32) -> (i32, i32) {
    %c0_i32 = arith.constant 0 : i32
    %c0_i32_0 = arith.constant 0 : i32
    %c0_i32_1 = arith.constant 0 : i32
    return %c0_i32, %c0_i32_0 : i32, i32
  }
  func.func @transform_2(%arg0: i32) -> (i32, i32) {
    %c0_i32 = arith.constant 0 : i32
    %c0_i32_0 = arith.constant 0 : i32
    %c0_i32_1 = arith.constant 0 : i32
    return %c0_i32, %c0_i32_0 : i32, i32
  }
  func.func @transform_3(%arg0: i32) -> (i32, i32) {
    %c0_i32 = arith.constant 0 : i32
    %c0_i32_0 = arith.constant 0 : i32
    %c0_i32_1 = arith.constant 0 : i32
    return %c0_i32, %c0_i32_0 : i32, i32
  }
  func.func @transform_4(%arg0: i32) -> (i32, i32) {
    %c0_i32 = arith.constant 0 : i32
    %c0_i32_0 = arith.constant 0 : i32
    %c0_i32_1 = arith.constant 0 : i32
    return %c0_i32, %c0_i32_0 : i32, i32
  }
  func.func @transform_5(%arg0: i32) -> i32 {
    %c0_i32 = arith.constant 0 : i32
    %c0_i32_0 = arith.constant 0 : i32
    return %c0_i32 : i32
  }
  func.func @transform_6(%arg0: i32) -> (i32, i32) {
    %c0_i32 = arith.constant 0 : i32
    %c0_i32_0 = arith.constant 0 : i32
    return %c0_i32, %arg0 : i32, i32
  }
}

</mosaic_0001>

<bundles_post_ra>
// kernel: tpu_custom_call.1
= control target key start
LH: loop header
LB: loop body
LE: loop exit
PB: predicated region body
PF: predicated region fallthrough
CT: control target
= control target key end

     0   :  { %vm194_vm0 = vcmask 261120   ;;  %v830_v3 = vmov 0   ;;  %s1016_s0 = inlined_call_operand.vmem [shape: bf16[32,128], index: 0, kind: input, shape index: {}]   ;;  %s1017_s1 = inlined_call_operand.vmem [shape: bf16[128,32], index: 1, kind: input, shape index: {}]   ;;  %s1018_s2 = inlined_call_operand.vmem [shape: bf16[128,128], index: 2, kind: input, shape index: {}]   ;;  %s1019_s3 = inlined_call_operand.vmem [shape: bf16[8,128], index: 3, kind: input, shape index: {}]   ;;  %s1020_s4 = inlined_call_operand.vmem [shape: f32[128,2], index: 4, kind: input, shape index: {}]   ;;  %s1021_s5 = inlined_call_operand.<no memory space> [shape: f32[1], index: 5, kind: input, shape index: {}]   ;;  %s1022_s6 = inlined_call_operand.hbm [shape: f32[1,128], index: 6, kind: output, shape index: {}]  }
   0x1   :  { %v790_v0 = vld [vmem:[%s1016_s0 + $0x8] sm:$0xff]   ;;  %v791_v1 = vld [vmem:[%s1016_s0] sm:$0xff]   ;;  %786 = vset.pattern.permute.xlu0 %v830_v3  ;;  %787 = vset.pattern.permute.xlu1 %v830_v3  ;;  %v794_v5 = vld [vmem:[%s1017_s1 + $0x10] sm:$0xff]  }
   0x2   :  { %709 = vmatprep.subr.bf16.mxu0 %v790_v0  ;;  %v792_v2 = vld [vmem:[%s1017_s1] sm:$0xff]   ;;  %v793_v4 = vld [vmem:[%s1017_s1 + $0x8] sm:$0xff]   ;;  %v40_v6 = vld [vmem:[%s1020_s4 + $0x70] sm:$0xff] }
   0x3   :  { %710 = vmatpush3.bf16.msra.mxu0 %v790_v0  ;;  %713 = vmatprep.mubr.msk.bf16.mxu0 %vm194_vm0, %v792_v2  ;;  %v38_v7 = vld [vmem:[%s1020_s4 + $0x60] sm:$0xff]  ;;  %v41_v8 = vld [vmem:[%s1020_s4 + $0x78] sm:$0xff]  ;;  %v39_v9 = vld [vmem:[%s1020_s4 + $0x68] sm:$0xff] }
   0x4   :  { %711 = vmatprep.subr.bf16.mxu0 %v791_v1  ;;  %134 = vperm.xlu0 %786, %v40_v6   ;;  %v795_v10 = vld [vmem:[%s1017_s1 + $0x18] sm:$0xff]   ;;  %v796_v11 = vld [vmem:[%s1017_s1 + $0x20] sm:$0xff]   ;;  %v36_v12 = vld [vmem:[%s1020_s4 + $0x50] sm:$0xff] }
   0x5   :  { %124 = vperm.xlu1 %787, %v38_v7   ;;  %v37_v13 = vld [vmem:[%s1020_s4 + $0x58] sm:$0xff]  ;;  %v34_v14 = vld [vmem:[%s1020_s4 + $0x40] sm:$0xff] }
   0x7   :  { %712 = vmatpush3.bf16.msra.mxu0 %v791_v1 }
   0x8   :  { %139 = vperm.xlu0 %786, %v41_v8  }
   0x9   :  { %129 = vperm.xlu1 %787, %v39_v9  }
   0xa   :  { %714 = vmatmul.mubr.msk.bf16.vlgmr.msra.gmra.mxu0 %vm194_vm0, %v793_v4 }
   0xb   :  { %717 = vmatprep.mubr.msk.bf16.mxu0 %vm194_vm0, %v794_v5 }
   0xc   :  { %114 = vperm.xlu0 %786, %v36_v12  }
   0xd   :  { %119 = vperm.xlu1 %787, %v37_v13  }
  0x12   :  { %718 = vmatmul.mubr.msk.bf16.gmra.mxu0 %vm194_vm0, %v795_v10 }
  0x13   :  { %721 = vmatprep.mubr.msk.bf16.mxu0 %vm194_vm0, %v796_v11 }
  0x14   :  { %12 = vsyncpa [#allocation4], 0  ;;  %v35_v15 = vld [vmem:[%s1020_s4 + $0x48] sm:$0xff]  ;;  %v798_v17 = vld [vmem:[%s1017_s1 + $0x30] sm:$0xff]   ;;  %104 = vperm.xlu0 %786, %v34_v14   ;;  %v831_v28 = vmov 1   ;;  %vm833_vm1 = vmmov 0  }
  0x15   :  { %v797_v16 = vld [vmem:[%s1017_s1 + $0x28] sm:$0xff]   ;;  %109 = vperm.xlu1 %787, %v35_v15   ;;  %v32_v18 = vld [vmem:[%s1020_s4 + $0x30] sm:$0xff]  ;;  %v33_v19 = vld [vmem:[%s1020_s4 + $0x38] sm:$0xff]  ;;  %s834_s15 = smov [#allocation3]  }
  0x16   :  { %v30_v20 = vld [vmem:[%s1020_s4 + $0x20] sm:$0xff]  ;;  %v31_v21 = vld [vmem:[%s1020_s4 + $0x28] sm:$0xff]  ;;  %v799_v22 = vld [vmem:[%s1017_s1 + $0x38] sm:$0xff]   ;;  %s640_s16 = sshll.u32 %s834_s15, 4  ;;  %s641_s16 = int_to_ptr.vmem [resolvable:$true] %s640_s16 }
  0x17   :  { %v28_v23 = vld [vmem:[%s1020_s4 + $0x10] sm:$0xff]  ;;  %v29_v24 = vld [vmem:[%s1020_s4 + $0x18] sm:$0xff]  ;;  %v26_v25 = vld [vmem:[%s1020_s4] sm:$0xff]  ;;  %s808_s17 = scalar_lea.vmem %s641_s16, 16  ;;  %s812_s18 = scalar_lea.vmem %s641_s16, 32 }
  0x18   :  { %94 = vperm.xlu0 %786, %v32_v18   ;;  %v27_v26 = vld [vmem:[%s1020_s4 + $0x8] sm:$0xff]  ;;  %v800_v27 = vld [vmem:[%s1018_s2] sm:$0xff]   ;;  %p809_p0 = scmp.ne.s32.totalorder %s641_s16, %s808_s17  ;;  %p813_p1 = scmp.lt.s32.totalorder %s641_s16, %s641_s16 }
  0x19   :  { %99 = vperm.xlu1 %787, %v33_v19   ;;  %745 = vmatprep.mubr.bf16.mxu1 %v800_v27  ;;  %p814_p2 = scmp.lt.s32.totalorder %s812_s18, %s808_s17 }
  0x1a   :  { %722 = vmatmul.mubr.msk.bf16.gmra.mxu0 %vm194_vm0, %v797_v16 }
  0x1b   :  { %725 = vmatprep.mubr.msk.bf16.mxu0 %vm194_vm0, %v798_v17  ;;  %p815_p3 = por %p814_p2, %p813_p1 }
  0x1c   :  { %84 = vperm.xlu0 %786, %v30_v20  }
  0x1d   :  { %89 = vperm.xlu1 %787, %v31_v21   ;;  %p816_p4 = pnand %p815_p3, %p809_p0 }
  0x20   :  { %74 = vperm.xlu0 %786, %v28_v23  }
  0x21   :  { %79 = vperm.xlu1 %787, %v29_v24  }
  0x22   :  { %726 = vmatmul.mubr.msk.bf16.gmra.mxu0 %vm194_vm0, %v799_v22 }
  0x24   :  { %64 = vperm.xlu0 %786, %v26_v25  }
  0x25   :  { %69 = vperm.xlu1 %787, %v27_v26  }
  0x28   :  { %788 = vset.pattern.permute.xlu0 %v831_v28 }
  0x29   :  { %789 = vset.pattern.permute.xlu1 %v831_v28  ;;  %413 = vperm.xlu0 %788, %v40_v6  }
  0x2a   :  { %417 = vperm.xlu1 %789, %v41_v8  }
  0x2d   :  { %409 = vperm.xlu0 %788, %v39_v9  }
  0x2e   :  { %405 = vperm.xlu1 %789, %v38_v7  }
  0x31   :  { %401 = vperm.xlu0 %788, %v37_v13  }
  0x32   :  { %397 = vperm.xlu1 %789, %v36_v12  }
  0x35   :  { %393 = vperm.xlu0 %788, %v35_v15  }
  0x36   :  { %389 = vperm.xlu1 %789, %v34_v14  }
  0x39   :  { %385 = vperm.xlu0 %788, %v33_v19  }
  0x3a   :  { %381 = vperm.xlu1 %789, %v32_v18  }
  0x3d   :  { %377 = vperm.xlu0 %788, %v31_v21  }
  0x3e   :  { %373 = vperm.xlu1 %789, %v30_v20  }
  0x41   :  { %369 = vperm.xlu0 %788, %v29_v24  }
  0x42   :  { %365 = vperm.xlu1 %789, %v28_v23  }
  0x45   :  { %361 = vperm.xlu0 %788, %v27_v26  }
  0x46   :  { %357 = vperm.xlu1 %789, %v26_v25  }
  0x7f   :  { %v135_v34 = vpop.permute.xlu0 %134 }
  0x80   :  { %v125_v32 = vpop.permute.xlu1 %124 }
  0x83   :  { %v140_v39 = vpop.permute.xlu0 %139 }
  0x84   :  { %v130_v37 = vpop.permute.xlu1 %129 }
  0x87   :  { %v115_v44 = vpop.permute.xlu0 %114 }
  0x88   :  { %v120_v42 = vpop.permute.xlu1 %119 }
  0x8f   :  { %v105_v49 = vpop.permute.xlu0 %104 }
  0x90   :  { %v110_v47 = vpop.permute.xlu1 %109 }
  0x93   :  { %v95_v61 = vpop.permute.xlu0 %94 }
  0x94   :  { %v100_v55 = vpop.permute.xlu1 %99 }
  0x97   :  { %v85_v8 = vpop.permute.xlu0 %84 }
  0x98   :  { %v90_v5 = vpop.permute.xlu1 %89 }
  0x9b   :  { %v75_v18 = vpop.permute.xlu0 %74 }
  0x9c   :  { %v80_v14 = vpop.permute.xlu1 %79 }
  0x9f   :  { %v65_v27 = vpop.permute.xlu0 %64 }
  0xa0   :  { %v70_v24 = vpop.permute.xlu1 %69 }
  0xca   :  { %v959_v29 = vpop.f32.mrf.mxu0 }
  0xcb   :  { %v262_v25 = vadd.f32 %v959_v29, %v75_v18  ;;  %v801_v29 = vld [vmem:[%s1018_s2 + $0x8] sm:$0xff]  }
  0xcc   :  { %v961_v30 = vpop.f32.mrf.mxu0 }
  0xce   :  { %v716_v31 = vpop.f32.mrf.mxu0 }
  0xcf   :  { %v265_v21 = vadd.f32 %v716_v31, %v80_v14 }
  0xd0   :  { %v963_v33 = vpop.f32.mrf.mxu0 }
  0xd1   :  { %v319_v28 = vmax.f32 %v265_v21, 0.0 }
  0xd2   :  { %v719_v35 = vpop.f32.mrf.mxu0 }
  0xd3   :  { %v278_v12 = vadd.f32 %v719_v35, %v95_v61  ;;  %v318_v35 = vmax.f32 %v262_v25, 0.0 }
  0xd4   :  { %v269_v36 = vpop.f32.mrf.mxu0 }
  0xd5   :  { %v322_v19 = vmax.f32 %v278_v12, 0.0  ;;  %v270_v20 = vadd.f32 %v269_v36, %v85_v8  ;;  %v349_v36 = vpack.c.bf16 %v319_v28, %v318_v35 }
  0xd6   :  { %v720_v38 = vpop.f32.mrf.mxu0 }
  0xd7   :  { %v281_v9 = vadd.f32 %v720_v38, %v100_v55  ;;  %v320_v26 = vmax.f32 %v270_v20, 0.0 }
  0xd8   :  { %v272_v40 = vpop.f32.mrf.mxu0 }
  0xd9   :  { %v323_v15 = vmax.f32 %v281_v9, 0.0  ;;  %v273_v16 = vadd.f32 %v272_v40, %v90_v5  ;;  %v804_v40 = vld [vmem:[%s1018_s2 + $0x20] sm:$0xff]  }
  0xda   :  { %v723_v41 = vpop.f32.mrf.mxu0 }
  0xdb   :  { %v294_v62 = vadd.f32 %v723_v41, %v115_v44  ;;  %v351_v22 = vpack.c.bf16 %v323_v15, %v322_v19  ;;  %v321_v23 = vmax.f32 %v273_v16, 0.0  ;;  %v805_v41 = vld [vmem:[%s1018_s2 + $0x28] sm:$0xff]   ;;  %v832_v44 = vmov 0.0  }
  0xdc   :  { %v285_v43 = vpop.f32.mrf.mxu0  ;;  %761 = vmatprep.subr.bf16.mxu0 %v832_v44  ;;  %777 = vmatprep.mubr.msk.bf16.mxu0 %vm833_vm1, %v832_v44 }
  0xdd   :  { %v326_v6 = vmax.f32 %v294_v62, 0.0  ;;  %v286_v7 = vadd.f32 %v285_v43, %v105_v49  ;;  %v807_v43 = vld [vmem:[%s1018_s2 + $0x38] sm:$0xff]   ;;  %v414_v49 = vpop.permute.xlu0 %413 }
  0xde   :  { %v724_v45 = vpop.f32.mrf.mxu0 }
  0xdf   :  { %v297_v57 = vadd.f32 %v724_v45, %v120_v42  ;;  %v324_v13 = vmax.f32 %v286_v7, 0.0  ;;  %v806_v42 = vld [vmem:[%s1018_s2 + $0x30] sm:$0xff]  }
  0xe0   :  { %v288_v46 = vpop.f32.mrf.mxu0 }
  0xe1   :  { %v327_v2 = vmax.f32 %v297_v57, 0.0  ;;  %v289_v3 = vadd.f32 %v288_v46, %v110_v47 }
  0xe2   :  { %v727_v48 = vpop.f32.mrf.mxu0 }
  0xe3   :  { %v310_v51 = vadd.f32 %v727_v48, %v135_v34  ;;  %v353_v10 = vpack.c.bf16 %v327_v2, %v326_v6  ;;  %v325_v11 = vmax.f32 %v289_v3, 0.0  ;;  %v350_v34 = vpack.c.bf16 %v321_v23, %v320_v26 }
  0xe4   :  { %v301_v50 = vpop.f32.mrf.mxu0 }
  0xe5   :  { %v302_v53 = vadd.f32 %v301_v50, %v125_v32  ;;  %v330_v58 = vmax.f32 %v310_v51, 0.0  ;;  %v352_v17 = vpack.c.bf16 %v325_v11, %v324_v13  ;;  %v257_v32 = vadd.f32 %v963_v33, %v70_v24  ;;  %v802_v33 = vld [vmem:[%s1018_s2 + $0x10] sm:$0xff]   ;;  %v418_v51 = vpop.permute.xlu1 %417 }
  0xe6   :  { %v728_v52 = vpop.f32.mrf.mxu0 }
  0xe7   :  { %v313_v54 = vadd.f32 %v728_v52, %v140_v39  ;;  %v328_v63 = vmax.f32 %v302_v53, 0.0  ;;  %v317_v31 = vmax.f32 %v257_v32, 0.0 }
  0xe8   :  { %v304_v56 = vpop.f32.mrf.mxu0 }
  0xe9   :  { %v331_v59 = vmax.f32 %v313_v54, 0.0  ;;  %v305_v60 = vadd.f32 %v304_v56, %v130_v37  ;;  %v254_v37 = vadd.f32 %v961_v30, %v65_v27  ;;  %v803_v30 = vld [vmem:[%s1018_s2 + $0x18] sm:$0xff]   ;;  %v410_v54 = vpop.permute.xlu0 %409  ;;  %v406_v56 = vpop.permute.xlu1 %405 }
  0xeb   :  { %v329_v0 = vmax.f32 %v305_v60, 0.0  ;;  %v355_v1 = vpack.c.bf16 %v331_v59, %v330_v58  ;;  %v316_v38 = vmax.f32 %v254_v37, 0.0 }
  0xed   :  { %v354_v4 = vpack.c.bf16 %v329_v0, %v328_v63  ;;  %729 = vmatprep.subr.bf16.mxu1 %v355_v1  ;;  %v348_v39 = vpack.c.bf16 %v317_v31, %v316_v38  ;;  %v402_v59 = vpop.permute.xlu0 %401  ;;  %v398_v61 = vpop.permute.xlu1 %397 }
  0xee   :  { %730 = vmatpush3.bf16.msra.mxu1 %v355_v1 }
  0xef   :  { %731 = vmatprep.subr.bf16.mxu1 %v354_v4 }
  0xf1   :  { %v394_v0 = vpop.permute.xlu0 %393  ;;  %v390_v3 = vpop.permute.xlu1 %389 }
  0xf2   :  { %732 = vmatpush3.bf16.msra.mxu1 %v354_v4 }
  0xf3   :  { %733 = vmatprep.subr.bf16.mxu1 %v353_v10 }
  0xf5   :  { %v386_v11 = vpop.permute.xlu0 %385  ;;  %v382_v15 = vpop.permute.xlu1 %381 }
  0xf6   :  { %734 = vmatpush3.bf16.msra.mxu1 %v353_v10 }
  0xf7   :  { %735 = vmatprep.subr.bf16.mxu1 %v352_v17 }
  0xf9   :  { %v378_v21 = vpop.permute.xlu0 %377  ;;  %v374_v24 = vpop.permute.xlu1 %373 }
  0xfa   :  { %736 = vmatpush3.bf16.msra.mxu1 %v352_v17 }
  0xfb   :  { %737 = vmatprep.subr.bf16.mxu1 %v351_v22 }
  0xfd   :  { %v366_v31 = vpop.permute.xlu1 %365 }
  0xfe   :  { %738 = vmatpush3.bf16.msra.mxu1 %v351_v22 }
  0xff   :  { %739 = vmatprep.subr.bf16.mxu1 %v350_v34 }
 0x102   :  { %740 = vmatpush3.bf16.msra.mxu1 %v350_v34  ;;  %v370_v34 = vpop.permute.xlu0 %369 }
 0x103   :  { %741 = vmatprep.subr.bf16.mxu1 %v349_v36 }
 0x106   :  { %742 = vmatpush3.bf16.msra.mxu1 %v349_v36 }
 0x107   :  { %743 = vmatprep.subr.bf16.mxu1 %v348_v39 }
 0x10a   :  { %744 = vmatpush3.bf16.msra.mxu1 %v348_v39 }
 0x10d   :  { %746 = vmatmul.mubr.bf16.vlgmr.msra.gmra.mxu1 %v801_v29 }
 0x10e   :  { %749 = vmatprep.mubr.bf16.mxu1 %v802_v33 }
 0x115   :  { %750 = vmatmul.mubr.bf16.gmra.mxu1 %v803_v30 }
 0x116   :  { %753 = vmatprep.mubr.bf16.mxu1 %v804_v40  ;;  %v362_v40 = vpop.permute.xlu0 %361 }
 0x11d   :  { %754 = vmatmul.mubr.bf16.gmra.mxu1 %v805_v41 }
 0x11e   :  { %757 = vmatprep.mubr.bf16.mxu1 %v806_v42 }
 0x125   :  { %758 = vmatmul.mubr.bf16.gmra.mxu1 %v807_v43  ;;  %v358_v43 = vpop.permute.xlu1 %357 }
 0x1cd   :  { %v991_v45 = vpop.f32.mrf.mxu1 }
 0x1ce   :  { %v511_v41 = vadd.f32 %v991_v45, %v366_v31 }
 0x1cf   :  { %v993_v46 = vpop.f32.mrf.mxu1 }
 0x1d1   :  { %v748_v47 = vpop.f32.mrf.mxu1 }
 0x1d2   :  { %v514_v29 = vadd.f32 %v748_v47, %v370_v34 }
 0x1d3   :  { %v995_v48 = vpop.f32.mrf.mxu1 }
 0x1d5   :  { %v751_v50 = vpop.f32.mrf.mxu1 }
 0x1d6   :  { %v527_v28 = vadd.f32 %v751_v50, %v382_v15  ;;  %v506_v50 = vadd.f32 %v995_v48, %v362_v40 }
 0x1d7   :  { %v518_v52 = vpop.f32.mrf.mxu1 }
 0x1d8   :  { %v571_v38 = vmax.f32 %v527_v28, 0.0  ;;  %v519_v39 = vadd.f32 %v518_v52, %v374_v24  ;;  %v503_v52 = vadd.f32 %v993_v46, %v358_v43  ;;  %v631_v46 = vstv %s1021_s5 }
 0x1d9   :  { %v752_v53 = vpop.f32.mrf.mxu1 }
 0x1da   :  { %v530_v25 = vadd.f32 %v752_v53, %v386_v11  ;;  %v569_v42 = vmax.f32 %v519_v39, 0.0  ;;  %v567_v53 = vmax.f32 %v511_v41, 0.0 }
 0x1db   :  { %v521_v55 = vpop.f32.mrf.mxu1 }
 0x1dc   :  { %v572_v35 = vmax.f32 %v530_v25, 0.0  ;;  %v522_v37 = vadd.f32 %v521_v55, %v378_v21  ;;  %v565_v55 = vmax.f32 %v503_v52, 0.0 }
 0x1dd   :  { %v755_v57 = vpop.f32.mrf.mxu1 }
 0x1de   :  { %v543_v16 = vadd.f32 %v755_v57, %v398_v61  ;;  %v585_v33 = vpack.c.bf16 %v572_v35, %v571_v38  ;;  %v570_v30 = vmax.f32 %v522_v37, 0.0 }
 0x1df   :  { %v534_v58 = vpop.f32.mrf.mxu1 }
 0x1e0   :  { %v575_v22 = vmax.f32 %v543_v16, 0.0  ;;  %v535_v23 = vadd.f32 %v534_v58, %v390_v3 }
 0x1e1   :  { %v756_v60 = vpop.f32.mrf.mxu1 }
 0x1e2   :  { %v546_v12 = vadd.f32 %v756_v60, %v402_v59  ;;  %v573_v32 = vmax.f32 %v535_v23, 0.0 }
 0x1e3   :  { %v537_v62 = vpop.f32.mrf.mxu1 }
 0x1e4   :  { %v576_v18 = vmax.f32 %v546_v12, 0.0  ;;  %v538_v19 = vadd.f32 %v537_v62, %v394_v0 }
 0x1e5   :  { %v759_v63 = vpop.f32.mrf.mxu1 }
 0x1e6   :  { %v559_v2 = vadd.f32 %v759_v63, %v414_v49  ;;  %v587_v26 = vpack.c.bf16 %v576_v18, %v575_v22  ;;  %v574_v27 = vmax.f32 %v538_v19, 0.0  ;;  %v568_v49 = vmax.f32 %v514_v29, 0.0 }
 0x1e7   :  { %v550_v1 = vpop.f32.mrf.mxu1 }
 0x1e8   :  { %v579_v7 = vmax.f32 %v559_v2, 0.0  ;;  %v551_v8 = vadd.f32 %v550_v1, %v406_v56  ;;  %v586_v36 = vpack.c.bf16 %v574_v27, %v573_v32  ;;  %v583_v47 = vpack.c.bf16 %v568_v49, %v567_v53  ;;  %v581_v56 = vld [vmem:[%s1019_s3] sm:$0xf] }
 0x1e9   :  { %v760_v4 = vpop.f32.mrf.mxu1 }
 0x1ea   :  { %v562_v5 = vadd.f32 %v760_v4, %v418_v51  ;;  %v577_v17 = vmax.f32 %v551_v8, 0.0  ;;  %v584_v51 = vpack.c.bf16 %v570_v30, %v569_v42 }
 0x1eb   :  { %v553_v6 = vpop.f32.mrf.mxu1 }
 0x1ec   :  { %v580_v9 = vmax.f32 %v562_v5, 0.0  ;;  %v554_v10 = vadd.f32 %v553_v6, %v410_v54  ;;  %v566_v54 = vmax.f32 %v506_v50, 0.0 }
 0x1ee   :  { %v589_v13 = vpack.c.bf16 %v580_v9, %v579_v7  ;;  %v578_v14 = vmax.f32 %v554_v10, 0.0  ;;  %v582_v45 = vpack.c.bf16 %v566_v54, %v565_v55 }
 0x1f0   :  { %762 = vmatpush3.bf16.msra.mxu0 %v589_v13  ;;  %v588_v20 = vpack.c.bf16 %v578_v14, %v577_v17 }
 0x1f1   :  { %763 = vmatprep.subr.bf16.mxu0 %v832_v44 }
 0x1f4   :  { %764 = vmatpush3.bf16.msra.mxu0 %v588_v20 }
 0x1f5   :  { %765 = vmatprep.subr.bf16.mxu0 %v832_v44 }
 0x1f8   :  { %766 = vmatpush3.bf16.msra.mxu0 %v587_v26 }
 0x1f9   :  { %767 = vmatprep.subr.bf16.mxu0 %v832_v44 }
 0x1fc   :  { %768 = vmatpush3.bf16.msra.mxu0 %v586_v36 }
 0x1fd   :  { %769 = vmatprep.subr.bf16.mxu0 %v832_v44 }
 0x200   :  { %770 = vmatpush3.bf16.msra.mxu0 %v585_v33 }
 0x201   :  { %771 = vmatprep.subr.bf16.mxu0 %v832_v44 }
 0x204   :  { %772 = vmatpush3.bf16.msra.mxu0 %v584_v51 }
 0x205   :  { %773 = vmatprep.subr.bf16.mxu0 %v832_v44 }
 0x208   :  { %774 = vmatpush3.bf16.msra.mxu0 %v583_v47 }
 0x209   :  { %775 = vmatprep.subr.bf16.mxu0 %v832_v44 }
 0x20c   :  { %776 = vmatpush3.bf16.msra.mxu0 %v582_v45 }
 0x20f   :  { %778 = vmatmul.mubr.bf16.vlgmr.msra.gmra.mxu0 %v581_v56 }
 0x2cf   :  { %v624_v48 = vpop.f32.mrf.mxu0 }
 0x2d0   :  { %v632_v57 = vadd.f32 %v631_v46, %v624_v48 }
 0x2d1   :  { %v779_v58 = vpop.f32.mrf.mxu0 }
 0x2d2   :  { %633 = vst [vmem:[#allocation3] sm:$0x1] %v632_v57 }
 0x2d3   :  { %v627_v59 = vpop.f32.mrf.mxu0 }
 0x2d4   :  { %819 = shalt.err (!%p816_p4)
}
 0x2d5   :  { %643 = dma.vmem_to_hbm [thread:$0]  %s641_s16, 16, %s1022_s6, [#allocation4]   ;;  %v780_v44 = vpop.f32.mrf.mxu0 }
 0x2d6   :  { %828 = dma.done.wait [#allocation4], 16  }
 0x2d7   :  { %829 = vsyncadd [#allocation4], 4294967280 }
 0x2d8   :  { %647 = vsyncpa [#allocation4], 1 }

</bundles_post_ra>
